<compile_context>
chip_gen: v7x
topology: tpu7x:2x2x1
jax: 0.10.0
libtpu: 0.0.40
codegen_flags: <defaults>
</compile_context>

<pallas_src>
import jax
import jax.numpy as jnp
from jax.experimental import pallas as pl
from jax.experimental.pallas import tpu as pltpu

_INV_SQRT2 = 0.7071067811865475  # 1/sqrt(2)
_LANES = 128
_TILE_ROWS = 1024                # up to (1024, 128) tiles (shrunk for small inputs)


def _fast_recip(v):
    """1/v: EUP vrcp seed + one Newton step (keeps ~f32 accuracy, frees VALU slots)."""
    r = pl.reciprocal(v, approx=True)
    return r * (2.0 - v * r)


def _gmm_entropy_kernel(x_ref, p_ref, out_ref):
    # x_ref:   (1, T, 128)      quantized latents (native dtype)
    # p_ref:   (1, 9, T, 128)   [prob0, mean0, scale0, prob1, mean1, scale1,
    #                            prob2, mean2, scale2]                (native dtype)
    # out_ref: (1, T, 128)      likelihood (native dtype)
    x = x_ref[0].astype(jnp.float32)

    def component_likelihood(mean, scale):
        s = jnp.maximum(scale.astype(jnp.float32), 1e-6)   # lower clamp only
        inv = _INV_SQRT2 * _fast_recip(s)
        d = (x - mean.astype(jnp.float32)) * inv            # shared term
        h = 0.5 * inv                                       # half-bin width, normalized
        # 0.5*(1+erf(hi)) - 0.5*(1+erf(lo)) == 0.5*(erf(hi)-erf(lo));
        # erf monotonic & h>0 -> difference is non-negative, abs not needed.
        # The 0.5 is folded into the final mixture sum below.
        return jax.lax.erf(d + h) - jax.lax.erf(d - h)

    l0 = component_likelihood(p_ref[0, 1], p_ref[0, 2])
    l1 = component_likelihood(p_ref[0, 4], p_ref[0, 5])
    l2 = component_likelihood(p_ref[0, 7], p_ref[0, 8])

    # Elementwise, numerically-stable 3-way softmax over the mixture logits.
    p0 = p_ref[0, 0].astype(jnp.float32)
    p1 = p_ref[0, 3].astype(jnp.float32)
    p2 = p_ref[0, 6].astype(jnp.float32)
    m = jnp.maximum(jnp.maximum(p0, p1), p2)
    e0 = jnp.exp(p0 - m)
    e1 = jnp.exp(p1 - m)
    e2 = jnp.exp(p2 - m)
    inv_den = _fast_recip(e0 + e1 + e2)

    like = 0.5 * (e0 * l0 + e1 * l1 + e2 * l2) * inv_den
    out_ref[0] = jnp.maximum(like, 1e-6).astype(out_ref.dtype)  # Low_bound forward


def _choose_tile_rows(rows, batch, tile_rows):
    """Largest sublane-aligned tile <= tile_rows that still gives the grid enough
    program steps to shard across both v7x TensorCores (target >= 8 steps)."""
    t = min(tile_rows, rows)
    while batch * ((rows + t - 1) // t) < 8 and t > 8:
        t = max(8, t // 2)
    if t != rows:
        t = max(8, (t // 8) * 8)   # (8,128) rule: 8-aligned unless taking full axis
    return t


def distribution_for_entropy2(x, p_dec, *, tile_rows=_TILE_ROWS):
    """x: [B, C, H, W]; p_dec: [B, 9, C, H, W] -> likelihood [B, C, H, W] (x.dtype)."""
    B, C, H, W = x.shape
    assert p_dec.shape == (B, 9, C, H, W)
    out_dtype = x.dtype

    n = C * H * W
    pad = (-n) % _LANES
    x2 = x.reshape(B, n)            # free reshape (contiguous), native dtype
    p2 = p_dec.reshape(B, 9, n)     # free reshape (contiguous), native dtype
    if pad:
        # TODO(synk): only taken when C*H*W is not 128-aligned; a masked final
        # block would avoid this extra HBM round trip for ragged production shapes.
        x2 = jnp.pad(x2, ((0, 0), (0, pad)))
        p2 = jnp.pad(p2, ((0, 0), (0, 0), (0, pad)))
    n_pad = n + pad
    rows = n_pad // _LANES
    x3 = x2.reshape(B, rows, _LANES)
    p3 = p2.reshape(B, 9, rows, _LANES)

    t = _choose_tile_rows(rows, B, tile_rows)
    grid = (B, pl.cdiv(rows, t))

    n_elems = B * rows * _LANES
    cost = pl.CostEstimate(
        flops=200 * n_elems,
        transcendentals=9 * n_elems,
        bytes_accessed=n_elems * (x3.dtype.itemsize + 9 * p3.dtype.itemsize
                                  + jnp.dtype(out_dtype).itemsize),
    )

    out = pl.pallas_call(
        _gmm_entropy_kernel,
        out_shape=jax.ShapeDtypeStruct((B, rows, _LANES), out_dtype),
        grid_spec=pltpu.PrefetchScalarGridSpec(
            num_scalar_prefetch=0,
            grid=grid,
            in_specs=[
                pl.BlockSpec((1, t, _LANES), lambda b, j: (b, j, 0)),
                # If xprof shows exposed DMA on this slab (v5e), consider
                # pipeline_mode=pl.Buffered(3); left at default pending a trace.
                pl.BlockSpec((1, 9, t, _LANES), lambda b, j: (b, 0, j, 0)),
            ],
            out_specs=pl.BlockSpec((1, t, _LANES), lambda b, j: (b, j, 0)),
        ),
        compiler_params=pltpu.CompilerParams(
            dimension_semantics=("parallel", "parallel"),
            vmem_limit_bytes=32 * 1024 * 1024,
        ),
        cost_estimate=cost,
    )(x3, p3)

    out = out.reshape(B, n_pad)
    if pad:
        out = out[:, :n]
    return out.reshape(B, C, H, W)


def _reference(x, p_dec):
    x = x.astype(jnp.float32)
    p_dec = p_dec.astype(jnp.float32)
    chunks = [p_dec[:, i] for i in range(9)]
    prob0, mean0, scale0, prob1, mean1, scale1, prob2, mean2, scale2 = chunks
    probs = jax.nn.softmax(jnp.stack([prob0, prob1, prob2], axis=-1), axis=-1)

    def lik(mean, scale):
        scale = jnp.clip(scale, 1e-6, 1e10)
        cdf = lambda v: 0.5 * (1.0 + jax.lax.erf((v - mean) / (scale * jnp.sqrt(2.0))))
        return jnp.abs(cdf(x + 0.5) - cdf(x - 0.5))

    like = (probs[..., 0] * lik(mean0, scale0)
            + probs[..., 1] * lik(mean1, scale1)
            + probs[..., 2] * lik(mean2, scale2))
    return jnp.maximum(like, 1e-6)


if __name__ == "__main__":
    # TODO(synk): Low_bound's custom backward (gated straight-through gradient) is not
    # implemented -- forward pass only, matching the module's forward semantics.
    B, C, H, W = 2, 4, 16, 16
    key = jax.random.PRNGKey(0)
    kx, kp = jax.random.split(key)

    # x plays the role of quantized latents; p_dec holds (prob, mean, scale) x 3
    # mixture components predicted by an upstream context/hyper decoder.
    x = jnp.round(jax.random.normal(kx, (B, C, H, W), dtype=jnp.float32) * 3.0)
    p_dec = jax.random.normal(kp, (B, 9, C, H, W), dtype=jnp.float32)
    # Make the scale channels (2, 5, 8) positive, with a few exact zeros to
    # exercise the clamp-to-1e-6 path.
    for c in (2, 5, 8):
        p_dec = p_dec.at[:, c].set(jnp.abs(p_dec[:, c]) + 0.1)
    p_dec = p_dec.at[:, 2, 0, 0, :4].set(0.0)

    out = distribution_for_entropy2(x, p_dec)
    out = jax.block_until_ready(out)

    ref = _reference(x, p_dec)
    assert out.shape == (B, C, H, W)
    assert jnp.allclose(out, ref, atol=1e-5, rtol=1e-4), float(jnp.max(jnp.abs(out - ref)))

    print("KERNEL_OK")
</pallas_src>

<mosaic_0001>
module attributes {stable_mosaic.version = 11 : i64} {
  func.func @_gmm_entropy_kernel(%arg0: i32, %arg1: i32, %arg2: memref<1x8x128xf32, #tpu.memory_space<vmem>>, %arg3: memref<1x9x8x128xf32, #tpu.memory_space<vmem>>, %arg4: memref<1x8x128xf32, #tpu.memory_space<vmem>>) attributes {dimension_semantics = [#tpu.dimension_semantics<parallel>, #tpu.dimension_semantics<parallel>], iteration_bounds = array<i64: 2, 1>, scalar_prefetch = 0 : i64, scratch_operands = 0 : i64, tpu.core_type = #tpu.core_type<tc>, window_params = [{transform_indices = @transform_0, window_bounds = array<i64: 1, 8, 128>}, {transform_indices = @transform_1, window_bounds = array<i64: 1, 9, 8, 128>}, {transform_indices = @transform_2, window_bounds = array<i64: 1, 8, 128>}]} {
    %c0 = arith.constant 0 : index
    %c0_0 = arith.constant 0 : index
    %c0_1 = arith.constant 0 : index
    %0 = vector.load %arg2[%c0, %c0_0, %c0_1] : memref<1x8x128xf32, #tpu.memory_space<vmem>>, vector<1x8x128xf32>
    %1 = vector.shape_cast %0 : vector<1x8x128xf32> to vector<8x128xf32>
    %c0_2 = arith.constant 0 : index
    %c1 = arith.constant 1 : index
    %c0_3 = arith.constant 0 : index
    %c0_4 = arith.constant 0 : index
    %2 = vector.load %arg3[%c0_2, %c1, %c0_3, %c0_4] : memref<1x9x8x128xf32, #tpu.memory_space<vmem>>, vector<1x1x8x128xf32>
    %3 = vector.shape_cast %2 : vector<1x1x8x128xf32> to vector<8x128xf32>
    %c0_5 = arith.constant 0 : index
    %c2 = arith.constant 2 : index
    %c0_6 = arith.constant 0 : index
    %c0_7 = arith.constant 0 : index
    %4 = vector.load %arg3[%c0_5, %c2, %c0_6, %c0_7] : memref<1x9x8x128xf32, #tpu.memory_space<vmem>>, vector<1x1x8x128xf32>
    %5 = vector.shape_cast %4 : vector<1x1x8x128xf32> to vector<8x128xf32>
    %cst = arith.constant 9.99999997E-7 : f32
    %6 = vector.broadcast %cst : f32 to vector<8x128xf32>
    %7 = arith.maximumf %5, %6 : vector<8x128xf32>
    %8 = tpu.reciprocal %7 {approx = true} : vector<8x128xf32> -> vector<8x128xf32>
    %9 = arith.mulf %7, %8 : vector<8x128xf32>
    %cst_8 = arith.constant 2.000000e+00 : f32
    %10 = vector.broadcast %cst_8 : f32 to vector<8x128xf32>
    %11 = arith.subf %10, %9 : vector<8x128xf32>
    %12 = arith.mulf %8, %11 : vector<8x128xf32>
    %cst_9 = arith.constant 0.707106769 : f32
    %13 = vector.broadcast %cst_9 : f32 to vector<8x128xf32>
    %14 = arith.mulf %13, %12 : vector<8x128xf32>
    %15 = arith.subf %1, %3 : vector<8x128xf32>
    %16 = arith.mulf %15, %14 : vector<8x128xf32>
    %cst_10 = arith.constant 5.000000e-01 : f32
    %17 = vector.broadcast %cst_10 : f32 to vector<8x128xf32>
    %18 = arith.mulf %17, %14 : vector<8x128xf32>
    %19 = arith.addf %16, %18 : vector<8x128xf32>
    %20 = math.erf %19 : vector<8x128xf32>
    %21 = arith.subf %16, %18 : vector<8x128xf32>
    %22 = math.erf %21 : vector<8x128xf32>
    %23 = arith.subf %20, %22 : vector<8x128xf32>
    %c0_11 = arith.constant 0 : index
    %c4 = arith.constant 4 : index
    %c0_12 = arith.constant 0 : index
    %c0_13 = arith.constant 0 : index
    %24 = vector.load %arg3[%c0_11, %c4, %c0_12, %c0_13] : memref<1x9x8x128xf32, #tpu.memory_space<vmem>>, vector<1x1x8x128xf32>
    %25 = vector.shape_cast %24 : vector<1x1x8x128xf32> to vector<8x128xf32>
    %c0_14 = arith.constant 0 : index
    %c5 = arith.constant 5 : index
    %c0_15 = arith.constant 0 : index
    %c0_16 = arith.constant 0 : index
    %26 = vector.load %arg3[%c0_14, %c5, %c0_15, %c0_16] : memref<1x9x8x128xf32, #tpu.memory_space<vmem>>, vector<1x1x8x128xf32>
    %27 = vector.shape_cast %26 : vector<1x1x8x128xf32> to vector<8x128xf32>
    %cst_17 = arith.constant 9.99999997E-7 : f32
    %28 = vector.broadcast %cst_17 : f32 to vector<8x128xf32>
    %29 = arith.maximumf %27, %28 : vector<8x128xf32>
    %30 = tpu.reciprocal %29 {approx = true} : vector<8x128xf32> -> vector<8x128xf32>
    %31 = arith.mulf %29, %30 : vector<8x128xf32>
    %cst_18 = arith.constant 2.000000e+00 : f32
    %32 = vector.broadcast %cst_18 : f32 to vector<8x128xf32>
    %33 = arith.subf %32, %31 : vector<8x128xf32>
    %34 = arith.mulf %30, %33 : vector<8x128xf32>
    %cst_19 = arith.constant 0.707106769 : f32
    %35 = vector.broadcast %cst_19 : f32 to vector<8x128xf32>
    %36 = arith.mulf %35, %34 : vector<8x128xf32>
    %37 = arith.subf %1, %25 : vector<8x128xf32>
    %38 = arith.mulf %37, %36 : vector<8x128xf32>
    %cst_20 = arith.constant 5.000000e-01 : f32
    %39 = vector.broadcast %cst_20 : f32 to vector<8x128xf32>
    %40 = arith.mulf %39, %36 : vector<8x128xf32>
    %41 = arith.addf %38, %40 : vector<8x128xf32>
    %42 = math.erf %41 : vector<8x128xf32>
    %43 = arith.subf %38, %40 : vector<8x128xf32>
    %44 = math.erf %43 : vector<8x128xf32>
    %45 = arith.subf %42, %44 : vector<8x128xf32>
    %c0_21 = arith.constant 0 : index
    %c7 = arith.constant 7 : index
    %c0_22 = arith.constant 0 : index
    %c0_23 = arith.constant 0 : index
    %46 = vector.load %arg3[%c0_21, %c7, %c0_22, %c0_23] : memref<1x9x8x128xf32, #tpu.memory_space<vmem>>, vector<1x1x8x128xf32>
    %47 = vector.shape_cast %46 : vector<1x1x8x128xf32> to vector<8x128xf32>
    %c0_24 = arith.constant 0 : index
    %c8 = arith.constant 8 : index
    %c0_25 = arith.constant 0 : index
    %c0_26 = arith.constant 0 : index
    %48 = vector.load %arg3[%c0_24, %c8, %c0_25, %c0_26] : memref<1x9x8x128xf32, #tpu.memory_space<vmem>>, vector<1x1x8x128xf32>
    %49 = vector.shape_cast %48 : vector<1x1x8x128xf32> to vector<8x128xf32>
    %cst_27 = arith.constant 9.99999997E-7 : f32
    %50 = vector.broadcast %cst_27 : f32 to vector<8x128xf32>
    %51 = arith.maximumf %49, %50 : vector<8x128xf32>
    %52 = tpu.reciprocal %51 {approx = true} : vector<8x128xf32> -> vector<8x128xf32>
    %53 = arith.mulf %51, %52 : vector<8x128xf32>
    %cst_28 = arith.constant 2.000000e+00 : f32
    %54 = vector.broadcast %cst_28 : f32 to vector<8x128xf32>
    %55 = arith.subf %54, %53 : vector<8x128xf32>
    %56 = arith.mulf %52, %55 : vector<8x128xf32>
    %cst_29 = arith.constant 0.707106769 : f32
    %57 = vector.broadcast %cst_29 : f32 to vector<8x128xf32>
    %58 = arith.mulf %57, %56 : vector<8x128xf32>
    %59 = arith.subf %1, %47 : vector<8x128xf32>
    %60 = arith.mulf %59, %58 : vector<8x128xf32>
    %cst_30 = arith.constant 5.000000e-01 : f32
    %61 = vector.broadcast %cst_30 : f32 to vector<8x128xf32>
    %62 = arith.mulf %61, %58 : vector<8x128xf32>
    %63 = arith.addf %60, %62 : vector<8x128xf32>
    %64 = math.erf %63 : vector<8x128xf32>
    %65 = arith.subf %60, %62 : vector<8x128xf32>
    %66 = math.erf %65 : vector<8x128xf32>
    %67 = arith.subf %64, %66 : vector<8x128xf32>
    %c0_31 = arith.constant 0 : index
    %c0_32 = arith.constant 0 : index
    %c0_33 = arith.constant 0 : index
    %c0_34 = arith.constant 0 : index
    %68 = vector.load %arg3[%c0_31, %c0_32, %c0_33, %c0_34] : memref<1x9x8x128xf32, #tpu.memory_space<vmem>>, vector<1x1x8x128xf32>
    %69 = vector.shape_cast %68 : vector<1x1x8x128xf32> to vector<8x128xf32>
    %c0_35 = arith.constant 0 : index
    %c3 = arith.constant 3 : index
    %c0_36 = arith.constant 0 : index
    %c0_37 = arith.constant 0 : index
    %70 = vector.load %arg3[%c0_35, %c3, %c0_36, %c0_37] : memref<1x9x8x128xf32, #tpu.memory_space<vmem>>, vector<1x1x8x128xf32>
    %71 = vector.shape_cast %70 : vector<1x1x8x128xf32> to vector<8x128xf32>
    %c0_38 = arith.constant 0 : index
    %c6 = arith.constant 6 : index
    %c0_39 = arith.constant 0 : index
    %c0_40 = arith.constant 0 : index
    %72 = vector.load %arg3[%c0_38, %c6, %c0_39, %c0_40] : memref<1x9x8x128xf32, #tpu.memory_space<vmem>>, vector<1x1x8x128xf32>
    %73 = vector.shape_cast %72 : vector<1x1x8x128xf32> to vector<8x128xf32>
    %74 = arith.maximumf %69, %71 : vector<8x128xf32>
    %75 = arith.maximumf %74, %73 : vector<8x128xf32>
    %76 = arith.subf %69, %75 : vector<8x128xf32>
    %77 = math.exp %76 : vector<8x128xf32>
    %78 = arith.subf %71, %75 : vector<8x128xf32>
    %79 = math.exp %78 : vector<8x128xf32>
    %80 = arith.subf %73, %75 : vector<8x128xf32>
    %81 = math.exp %80 : vector<8x128xf32>
    %82 = arith.addf %77, %79 : vector<8x128xf32>
    %83 = arith.addf %82, %81 : vector<8x128xf32>
    %84 = tpu.reciprocal %83 {approx = true} : vector<8x128xf32> -> vector<8x128xf32>
    %85 = arith.mulf %83, %84 : vector<8x128xf32>
    %cst_41 = arith.constant 2.000000e+00 : f32
    %86 = vector.broadcast %cst_41 : f32 to vector<8x128xf32>
    %87 = arith.subf %86, %85 : vector<8x128xf32>
    %88 = arith.mulf %84, %87 : vector<8x128xf32>
    %89 = arith.mulf %77, %23 : vector<8x128xf32>
    %90 = arith.mulf %79, %45 : vector<8x128xf32>
    %91 = arith.addf %89, %90 : vector<8x128xf32>
    %92 = arith.mulf %81, %67 : vector<8x128xf32>
    %93 = arith.addf %91, %92 : vector<8x128xf32>
    %cst_42 = arith.constant 5.000000e-01 : f32
    %94 = vector.broadcast %cst_42 : f32 to vector<8x128xf32>
    %95 = arith.mulf %94, %93 : vector<8x128xf32>
    %96 = arith.mulf %95, %88 : vector<8x128xf32>
    %cst_43 = arith.constant 9.99999997E-7 : f32
    %97 = vector.broadcast %cst_43 : f32 to vector<8x128xf32>
    %98 = arith.maximumf %96, %97 : vector<8x128xf32>
    %c0_44 = arith.constant 0 : index
    %c0_45 = arith.constant 0 : index
    %c0_46 = arith.constant 0 : index
    %99 = vector.load %arg4[%c0_44, %c0_45, %c0_46] : memref<1x8x128xf32, #tpu.memory_space<vmem>>, vector<1x8x128xf32>
    %100 = vector.shape_cast %99 : vector<1x8x128xf32> to vector<8x128xf32>
    %101 = vector.shape_cast %98 : vector<8x128xf32> to vector<1x8x128xf32>
    tpu.vector_store %arg4[%c0_44, %c0_45, %c0_46], %101 {strides = array<i32>} : memref<1x8x128xf32, #tpu.memory_space<vmem>>, vector<1x8x128xf32>,
    return
  }
  func.func @transform_0(%arg0: i32, %arg1: i32) -> (i32, i32, i32) {
    %c0_i32 = arith.constant 0 : i32
    %c0_i32_0 = arith.constant 0 : i32
    return %arg0, %arg1, %c0_i32 : i32, i32, i32
  }
  func.func @transform_1(%arg0: i32, %arg1: i32) -> (i32, i32, i32, i32) {
    %c0_i32 = arith.constant 0 : i32
    %c0_i32_0 = arith.constant 0 : i32
    %c0_i32_1 = arith.constant 0 : i32
    return %arg0, %c0_i32, %arg1, %c0_i32_0 : i32, i32, i32, i32
  }
  func.func @transform_2(%arg0: i32, %arg1: i32) -> (i32, i32, i32) {
    %c0_i32 = arith.constant 0 : i32
    %c0_i32_0 = arith.constant 0 : i32
    return %arg0, %arg1, %c0_i32 : i32, i32, i32
  }
}

</mosaic_0001>

<bundles_post_ra>
// kernel: tpu_custom_call.1
= control target key start
LH: loop header
LB: loop body
LE: loop exit
PB: predicated region body
PF: predicated region fallthrough
CT: control target
= control target key end

     0   :  { %7 = vsyncpa [#allocation3], 0  ;;  %s954_s0 = inlined_call_operand.hbm [shape: f32[2,8,128], index: 0, kind: input, shape index: {}]   ;;  %s955_s1 = inlined_call_operand.hbm [shape: f32[2,9,8,128], index: 1, kind: input, shape index: {}]   ;;  %s956_s2 = inlined_call_operand.hbm [shape: f32[2,8,128], index: 2, kind: output, shape index: {}]  }
   0x1   :  { %9 = vsyncpa [#allocation3 + $0x1], 0 }
   0x2   :  { %10 = vsyncpa [#allocation6], 0 }
   0x3   :  { %12 = vsyncpa [#allocation6 + $0x1], 0 }
   0x4   :  { %13 = vsyncpa [#allocation4], 0 }
   0x5   :  { %15 = vsyncpa [#allocation4 + $0x1], 0  ;;  %s713_s9 = smov 0   ;;  %s715_s10 = smov 0  }
   0x6   :  { %s717_s11 = smov 0   ;;  %s719_s12 = smov 0  }
   0x7   :  { %s721_s13 = smov 0   ;;  %s723_s14 = smov 0  }
   0x8 LB: > { %s425_s15 = sadd.s32 4294967295, %s691_s14   ;;  %s426_s16 = sadd.s32 4294967294, %s691_s14   ;;  %s691_s14 = sphi %s723_s14, %s21_s14   ;;  %s687_s13 = sphi %s721_s13, %s975_s13   ;;  %s683_s12 = sphi %s719_s12, %s974_s12   ;;  %s679_s11 = sphi %s717_s11, %s973_s11   ;;  %s675_s10 = sphi %s715_s10, %s972_s10   ;;  %s671_s9 = sphi %s713_s9, %s971_s9  }
   0x9   : > { %s33_s17 = sadd.s32 1, %s687_s13  ;;  %s42_s18 = sadd.s32 1, %s679_s11 }
   0xa   : > { %p35_p0 = scmp.ge.s32.totalorder %s33_s17, 2  ;;  %p49_p1 = scmp.ne.s32.totalorder %s679_s11, %s675_s10 }
   0xb   : > { %p50_p2 = scmp.eq.s32.totalorder %s691_s14, 0  ;;  %p55_p3 = scmp.ne.s32.totalorder %s675_s10, %s671_s9 }
   0xc   : > { %s977_s17 = smov (%p35_p0, %s33_s17), 0  ;;  %p56_p5 = scmp.eq.s32.totalorder %s425_s15, 0 }
   0xd   : > { %p754_p4 = por %p50_p2, %p49_p1  ;;  %s37_s20 = ssub.s32 %s687_s13, %s977_s17 }
   0xe   : > { %p109_p6 = scmp.eq.s32.totalorder %s425_s15, 1  ;;  %p40_p7 = scmp.eq.s32.totalorder %s37_s20, 0 }
   0xf   : > { %p760_p8 = por %p56_p5, %p55_p3  ;;  %p115_p10 = scmp.eq.s32.totalorder %s426_s16, 1 }
  0x10   : > { %p764_p9 = por %p109_p6, %p49_p1  ;;  %p467_p13 = scmp.lt.s32.totalorder %s691_s14, 2 }
  0x11   : > { %s960_s21 = scalar_select %p760_p8, 1, 0 }
  0x12   : > { %s961_s22 = scalar_select %p764_p9, 1, 0 }
  0x13   : > { %s769_s23 = scalar_select %p40_p7, %s679_s11, %s42_s18  }
  0x14   : > { %p771_p11 = por %p115_p10, %p55_p3  ;;  %s778_s25 = sand.u32 1, %s679_s11  }
  0x15   : > { %s429_s26 = sshll.u32 %s778_s25, 3  ;;  %s430_s27 = sshll.u32 %s687_s13, 7 }
  0x16   : > { %s962_s24 = scalar_select %p771_p11, 1, 0 }
  0x17   : > { %s785_s30 = scalar_lea.hbm %s954_s0, %s430_s27  ;;  %s139_s3 = scalar_lea.vmem [#allocation2], %s429_s26 }
  0x18   : > { %s147_s4 = sshll.u32 %s139_s3, 4  ;;  %p791_p0 = pnand %p467_p13, %p754_p4  ;;  %s787_s4 = int_to_ptr.vmem [resolvable:$true] %s147_s4 }
  0x19   : > { %s136_s6 = scalar_lea.sflag [#allocation3], %s778_s25  ;;  %s545_s7 = scalar_lea.hbm %s785_s30, 128 }
  0x1a   : > { %p546_p3 = scmp.ne.s32.totalorder %s785_s30, %s545_s7  ;;  %p547_p5 = pneg %p791_p0 }
  0x1b   : > { %s550_s16 = scalar_lea.hbm %s954_s0, 256  ;;  %p551_p4 = scmp.lt.u32.totalorder %s785_s30, %s954_s0 }
  0x1c   : > { %p548_p6 = pnand %p547_p5, %p546_p3  ;;  %p552_p10 = scmp.lt.u32.totalorder %s550_s16, %s545_s7 }
  0x1d   : > { %p554_p12 = scmp.lt.u32.totalorder %s545_s7, %s785_s30 }
  0x1e   : > { %p549_p7 = pneg %p548_p6  ;;  %p553_p13 = por %p552_p10, %p551_p4 }
  0x20   : > { %p555_p1 = por %p554_p12, %p553_p13 }
  0x22   : > { %p556_p2 = pnand %p555_p1, %p549_p7 }
  0x24   : > { %559 = shalt.err (!%p556_p2)
}
  0x25   : > { %s560_s20 = scalar_lea.vmem %s787_s4, 128  ;;  %s693_s26 = smov [#allocation2]  }
  0x26   : > { %p561_p3 = scmp.ne.s32.totalorder %s787_s4, %s560_s20  ;;  %s565_s27 = sshll.u32 %s693_s26, 4  ;;  %s566_s27 = int_to_ptr.vmem [resolvable:$false] %s565_s27 }
  0x27   : > { %s567_s28 = scalar_lea.vmem %s566_s27, 256  ;;  %p568_p9 = scmp.lt.s32.totalorder %s787_s4, %s566_s27 }
  0x28   : > { %p563_p6 = pnand %p561_p3, %p547_p5  ;;  %p569_p4 = scmp.lt.s32.totalorder %s567_s28, %s560_s20 }
  0x2a   : > { %p564_p11 = pneg %p563_p6  ;;  %p570_p10 = por %p569_p4, %p568_p9 }
  0x2c   : > { %p571_p12 = pnand %p570_p10, %p564_p11 }
  0x2e   : > { %574 = shalt.err (!%p571_p12)
}
  0x2f   : > { %459 = dma.hbm_to_vmem [thread:$0]  (!%p791_p0), %s785_s30, 128, %s787_s4, %s136_s6  }
  0x30   : > { %p964_p1 = scmp.lt.s32.totalorder %s691_s14, 3  ;;  %p965_p2 = scmp.ge.s32.totalorder %s691_s14, 1 }
  0x31   : > { %s447_s3 = smul.u32 72, %s778_s25  ;;  %s155_s30 = scalar_lea.sflag [#allocation6], %s778_s25 }
  0x32   : > { %p827_p7 = pnand %p965_p2, %p964_p1  ;;  %s448_s7 = smul.u32 1152, %s687_s13 }
  0x33   : > { %s158_s18 = scalar_lea.vmem [#allocation5], %s447_s3  ;;  %s580_s26 = scalar_lea.hbm %s955_s1, 2304 }
  0x34   : > { %s836_s16 = scalar_lea.hbm %s955_s1, %s448_s7  ;;  %s166_s19 = sshll.u32 %s158_s18, 4  ;;  %s838_s19 = int_to_ptr.vmem [resolvable:$true] %s166_s19 }
  0x35   : > { %s575_s4 = scalar_lea.hbm %s836_s16, 1152  ;;  %p581_p3 = scmp.lt.u32.totalorder %s836_s16, %s955_s1 }
  0x36   : > { %p576_p9 = scmp.ne.s32.totalorder %s836_s16, %s575_s4  ;;  %p582_p6 = scmp.lt.u32.totalorder %s580_s26, %s575_s4 }
  0x37   : > { %p584_p10 = scmp.lt.u32.totalorder %s575_s4, %s836_s16 }
  0x38   : > { %p578_p11 = pnand %p576_p9, %p547_p5  ;;  %p583_p4 = por %p582_p6, %p581_p3 }
  0x3a   : > { %p579_p13 = pneg %p578_p11  ;;  %p585_p12 = por %p584_p10, %p583_p4 }
  0x3c   : > { %p586_p1 = pnand %p585_p12, %p579_p13 }
  0x3e   : > { %589 = shalt.err (!%p586_p1)
}
  0x3f   : > { %s590_s3 = scalar_lea.vmem %s838_s19, 1152  ;;  %s694_s7 = smov [#allocation5]  }
  0x40   : > { %p591_p2 = scmp.ne.s32.totalorder %s838_s19, %s590_s3  ;;  %s595_s8 = sshll.u32 %s694_s7, 4  ;;  %s596_s8 = int_to_ptr.vmem [resolvable:$false] %s595_s8 }
  0x41   : > { %s597_s15 = scalar_lea.vmem %s596_s8, 2304  ;;  %p598_p8 = scmp.lt.s32.totalorder %s838_s19, %s596_s8 }
  0x42   : > { %p593_p9 = pnand %p591_p2, %p547_p5  ;;  %p599_p3 = scmp.lt.s32.totalorder %s597_s15, %s590_s3 }
  0x44   : > { %p594_p11 = pneg %p593_p9  ;;  %p600_p6 = por %p599_p3, %p598_p8 }
  0x46   : > { %p601_p4 = pnand %p600_p6, %p594_p11 }
  0x48   : > { %604 = shalt.err (!%p601_p4)
}
  0x49   : > { %s695_s18 = smov 128   ;;  %s696_s4 = smov 8  }
  0x4a   : > { %462 = dma.hbm_to_vmem [thread:$0]  (!%p791_p0), %s836_s16, 1152, %s838_s19, %s155_s30, %s695_s18, %s695_s18, %s696_s4  }
  0x4b   : > { %178 = sbr.rel (%p827_p7) target bundleno = 155 (0x9b), region = 28  ;;  %s869_s6 = sand.u32 (!%p827_p7), 1, %s675_s10  }
  0x4c   : > { %s433_s20 = sshll.u32 (!%p827_p7), %s869_s6, 3  ;;  %s181_s26 = scalar_lea.sflag (!%p827_p7), [#allocation3], %s869_s6 }
  0x4d   : > { %s875_s27 = scalar_lea.vmem (!%p827_p7), [#allocation2], %s433_s20  ;;  %p967_p8 = scmp.ne.s32.totalorder (!%p827_p7), %s960_s21, 0 }
  0x52   : > { %658 = dma.done.wait (%p967_p8), %s181_s26, 128  }
  0x53   : > { %660 = vsyncadd (%p967_p8), %s181_s26, 4294967168  ;;  %s449_s25 = smul.u32 72, %s869_s6  ;;  %s190_s5 = scalar_lea.sflag [#allocation6], %s869_s6 }
  0x55   : > { %s883_s29 = scalar_lea.vmem [#allocation5], %s449_s25 }
  0x56   : > { %662 = dma.done.wait (%p967_p8), %s190_s5, 1152  }
  0x57   : > { %664 = vsyncadd (%p967_p8), %s190_s5, 4294966144  ;;  %v436_v0 = vld [vmem:[%s883_s29 + $0x10] sm:$0xff]  ;;  %v438_v2 = vld [vmem:[%s883_s29 + $0x28] sm:$0xff]  ;;  %s218_s21 = scalar_lea.vmem [#allocation7], %s433_s20  ;;  %s444_s19 = sshll.u32 %s683_s12, 7 }
  0x58   : > { %v224_v1 = vmax.f32 %v436_v0, 1e-06  ;;  %v242_v3 = vmax.f32 %v438_v2, 1e-06  ;;  %v440_v4 = vld [vmem:[%s883_s29 + $0x40] sm:$0xff]  ;;  %v441_v6 = vld [vmem:[%s883_s29 + $0x18] sm:$0xff]  ;;  %s907_s3 = scalar_lea.hbm %s956_s2, %s444_s19 }
  0x59   : > { %v274_v5 = vld [vmem:[%s883_s29] sm:$0xff]  ;;  %v260_v7 = vmax.f32 %v440_v4, 1e-06  ;;  %v442_v8 = vld [vmem:[%s883_s29 + $0x30] sm:$0xff]  ;;  %v435_v22 = vld [vmem:[%s883_s29 + $0x8] sm:$0xff]  ;;  %s320_s16 = sshll.u32 %s218_s21, 4  ;;  %s902_s16 = int_to_ptr.vmem [resolvable:$true] %s320_s16 }
  0x5a   : > { %519 = vrcp.f32 %v224_v1  ;;  %v279_v9 = vmax.f32 %v274_v5, %v441_v6  ;;  %v219_v21 = vld [vmem:[%s875_s27] sm:$0xff]  ;;  %v437_v25 = vld [vmem:[%s883_s29 + $0x20] sm:$0xff]  ;;  %v439_v28 = vld [vmem:[%s883_s29 + $0x38] sm:$0xff]  ;;  %s306_s7 = scalar_lea.sflag [#allocation4], %s869_s6  ;;  %s605_s8 = scalar_lea.vmem %s902_s16, 128 }
  0x5b   : > { %521 = vrcp.f32 %v242_v3  ;;  %v230_v30 = vsub.f32 %v219_v21, %v435_v22  ;;  %v248_v33 = vsub.f32 %v219_v21, %v437_v25  ;;  %v266_v36 = vsub.f32 %v219_v21, %v439_v28  ;;  %p606_p0 = scmp.ne.s32.totalorder %s902_s16, %s605_s8  ;;  %p968_p5 = scmp.ne.s32.totalorder %s961_s22, 0 }
  0x5c   : > { %523 = vrcp.f32 %v260_v7  ;;  %v280_v10 = vmax.f32 %v279_v9, %v442_v8  ;;  %s697_s12 = smov [#allocation7]  }
  0x5d   : > { %p607_p7 = pnand %p606_p0, %p968_p5  ;;  %s609_s15 = sshll.u32 %s697_s12, 4  ;;  %s610_s15 = int_to_ptr.vmem [resolvable:$false] %s609_s15 }
  0x5e   : > { %v281_v11 = vsub.f32 %v274_v5, %v280_v10  ;;  %v284_v12 = vsub.f32 %v441_v6, %v280_v10  ;;  %v287_v13 = vsub.f32 %v442_v8, %v280_v10  ;;  %s611_s18 = scalar_lea.vmem %s610_s15, 256  ;;  %p612_p10 = scmp.lt.s32.totalorder %s902_s16, %s610_s15 }
  0x5f   : > { %p608_p13 = pneg %p607_p7  ;;  %p613_p12 = scmp.lt.s32.totalorder %s611_s18, %s605_s8 }
  0x60   : > { %v282_v14 = vmul.f32 1.442695, %v281_v11  ;;  %v285_v15 = vmul.f32 1.442695, %v284_v12  ;;  %v288_v16 = vmul.f32 1.442695, %v287_v13 }
  0x61   : > { %p614_p1 = por %p613_p12, %p612_p10 }
  0x62   : > { %525 = vpow2.f32 %v282_v14 }
  0x63   : > { %527 = vpow2.f32 %v285_v15  ;;  %p615_p2 = pnand %p614_p1, %p608_p13 }
  0x64   : > { %v520_v17 = vpop.eup %519  ;;  %529 = vpow2.f32 %v288_v16 }
  0x65   : > { %v522_v18 = vpop.eup %521  ;;  %v226_v19 = vmul.f32 %v520_v17, %v224_v1 }
  0x66   : > { %v524_v20 = vpop.eup %523  ;;  %v244_v23 = vmul.f32 %v522_v18, %v242_v3 }
  0x67   : > { %v227_v24 = vsub.f32 2.0, %v226_v19  ;;  %v262_v26 = vmul.f32 %v524_v20, %v260_v7 }
  0x68   : > { %v245_v27 = vsub.f32 2.0, %v244_v23 }
  0x69   : > { %v228_v29 = vmul.f32 %v520_v17, %v227_v24  ;;  %v263_v31 = vsub.f32 2.0, %v262_v26 }
  0x6a   : > { %v246_v32 = vmul.f32 %v522_v18, %v245_v27 }
  0x6b   : > { %v229_v34 = vmul.f32 0.70710677, %v228_v29  ;;  %v264_v35 = vmul.f32 %v524_v20, %v263_v31 }
  0x6c   : > { %v526_v37 = vpop.eup %525  ;;  %v247_v38 = vmul.f32 0.70710677, %v246_v32 }
  0x6d   : > { %v528_v39 = vpop.eup %527  ;;  %v231_v40 = vmul.f32 %v230_v30, %v229_v34  ;;  %v232_v41 = vmul.f32 0.5, %v229_v34  ;;  %v265_v42 = vmul.f32 0.70710677, %v264_v35 }
  0x6e   : > { %v249_v43 = vmul.f32 %v248_v33, %v247_v38  ;;  %v250_v44 = vmul.f32 0.5, %v247_v38  ;;  %v290_v45 = vadd.f32 %v528_v39, %v526_v37  ;;  %v530_v50 = vpop.eup %529 }
  0x6f   : > { %v233_v46 = vadd.f32 %v232_v41, %v231_v40  ;;  %v235_v47 = vsub.f32 %v231_v40, %v232_v41  ;;  %v267_v48 = vmul.f32 %v266_v36, %v265_v42  ;;  %v268_v49 = vmul.f32 0.5, %v265_v42 }
  0x70   : > { %v251_v51 = vadd.f32 %v250_v44, %v249_v43  ;;  %v253_v52 = vsub.f32 %v249_v43, %v250_v44  ;;  %v291_v55 = vadd.f32 %v530_v50, %v290_v45 }
  0x71   : > { %531 = verf.f32 %v233_v46  ;;  %v269_v53 = vadd.f32 %v268_v49, %v267_v48  ;;  %v271_v54 = vsub.f32 %v267_v48, %v268_v49 }
  0x72   : > { %533 = verf.f32 %v235_v47 }
  0x73   : > { %535 = verf.f32 %v251_v51 }
  0x74   : > { %537 = verf.f32 %v253_v52 }
  0x75   : > { %539 = verf.f32 %v269_v53 }
  0x76   : > { %541 = verf.f32 %v271_v54 }
  0x77   : > { %543 = vrcp.f32 %v291_v55 }
  0x7b   : > { %v532_v56 = vpop.eup %531 }
  0x7c   : > { %v534_v57 = vpop.eup %533 }
  0x7d   : > { %v536_v58 = vpop.eup %535  ;;  %v237_v59 = vsub.f32 %v532_v56, %v534_v57 }
  0x7e   : > { %v538_v60 = vpop.eup %537 }
  0x7f   : > { %v540_v61 = vpop.eup %539  ;;  %v255_v62 = vsub.f32 %v536_v58, %v538_v60  ;;  %v296_v63 = vmul.f32 %v526_v37, %v237_v59 }
  0x80   : > { %v542_v0 = vpop.eup %541 }
  0x81   : > { %v544_v1 = vpop.eup %543  ;;  %v273_v2 = vsub.f32 %v540_v61, %v542_v0  ;;  %v297_v3 = vmul.f32 %v528_v39, %v255_v62 }
  0x82   : > { %v293_v4 = vmul.f32 %v544_v1, %v291_v55 }
  0x83   : > { %v298_v5 = vadd.f32 %v297_v3, %v296_v63  ;;  %v299_v6 = vmul.f32 %v530_v50, %v273_v2 }
  0x84   : > { %v294_v7 = vsub.f32 2.0, %v293_v4 }
  0x85   : > { %v300_v8 = vadd.f32 %v299_v6, %v298_v5 }
  0x86   : > { %v295_v9 = vmul.f32 %v544_v1, %v294_v7 }
  0x87   : > { %v301_v10 = vmul.f32 0.5, %v300_v8 }
  0x89   : > { %v302_v11 = vmul.f32 %v301_v10, %v295_v9 }
  0x8b   : > { %v303_v12 = vmax.f32 %v302_v11, 1e-06 }
  0x8d   : > { %304 = vst [vmem:[%s218_s21] sm:$0xff] %v303_v12 }
  0x8e   : > { %618 = shalt.err (!%p615_p2)
}
  0x8f   : > { %s619_s4 = scalar_lea.hbm %s907_s3, 128  ;;  %s623_s26 = scalar_lea.hbm %s956_s2, 256 }
  0x90   : > { %p620_p9 = scmp.ne.s32.totalorder %s907_s3, %s619_s4  ;;  %p624_p6 = scmp.lt.u32.totalorder %s907_s3, %s956_s2 }
  0x91   : > { %p625_p4 = scmp.lt.u32.totalorder %s623_s26, %s619_s4  ;;  %p627_p0 = scmp.lt.u32.totalorder %s619_s4, %s907_s3 }
  0x92   : > { %p621_p11 = pnand %p620_p9, %p968_p5 }
  0x93   : > { %p626_p8 = por %p625_p4, %p624_p6 }
  0x94   : > { %p622_p3 = pneg %p621_p11 }
  0x95   : > { %p628_p7 = por %p627_p0, %p626_p8 }
  0x97   : > { %p629_p13 = pnand %p628_p7, %p622_p3 }
  0x99   : > { %632 = shalt.err (!%p629_p13)
}
  0x9a   : > { %454 = dma.vmem_to_hbm [thread:$0]  (%p968_p5), %s902_s16, 128, %s907_s3, %s306_s7  }
  0x9b PF: > { %s332_s5 = sand.u32 1, %s671_s9   ;;  %p969_p10 = scmp.ne.s32.totalorder %s962_s24, 0 }
  0x9c   : > { %p970_p12 = scmp.ge.s32.totalorder %s691_s14, 2  ;;  %s333_s29 = scalar_lea.sflag [#allocation4], %s332_s5 }
  0x9e   : > { %p464_p1 = pnand %p970_p12, %p969_p10 }
  0xa0   : > { %666 = dma.done.wait (!%p464_p1), %s333_s29, 128  }
  0xa1   : > { %668 = vsyncadd (!%p464_p1), %s333_s29, 4294967168  ;;  %s21_s14 = sadd.s32 1, %s691_s14   ;;  %s971_s9 = smov %s675_s10 }
  0xa2   : > { %p18_p2 = scmp.ge.s32.totalorder %s21_s14, 4   ;;  %s972_s10 = smov %s679_s11 }
  0xa3   : > { %s973_s11 = smov %s769_s23  ;;  %s974_s12 = smov %s687_s13 }
  0xa4   : > { %s975_s13 = smov %s977_s17  ;;  %20 = sbr.rel (!%p18_p2) target bundleno = 8 (0x8), region = 94 }
  0xab   :  { %338 = vsyncpa [#allocation3], 1 }
  0xac   :  { %340 = vsyncpa [#allocation3 + $0x1], 1 }
  0xad   :  { %341 = vsyncpa [#allocation6], 1 }
  0xae   :  { %343 = vsyncpa [#allocation6 + $0x1], 1 }
  0xaf   :  { %344 = vsyncpa [#allocation4], 1 }
  0xb0   :  { %346 = vsyncpa [#allocation4 + $0x1], 1 }

</bundles_post_ra>
